<compile_context>
chip_gen: v5e
topology: v5e:2x2
jax: 0.10.0
libtpu: 0.0.40
codegen_flags: <defaults>
</compile_context>

<pallas_src>
import math

import jax
import jax.numpy as jnp
from jax.experimental import pallas as pl
from jax.experimental.pallas import tpu as pltpu


# ---------------------------------------------------------------------------
# Kernel: copy each input row-tile into its (static) lane range of the output
# row-tile.  The output tile is fully covered by the inputs, so no init.
# ---------------------------------------------------------------------------
def _make_concat_kernel(col_offsets, col_sizes):
    def kernel(*refs):
        *in_refs, o_ref = refs
        for x_ref, off, sz in zip(in_refs, col_offsets, col_sizes):
            o_ref[:, off:off + sz] = x_ref[...]
    return kernel


# ---------------------------------------------------------------------------
# Wrapper: torch.cat(xs, dim=dimension) semantics.
# ---------------------------------------------------------------------------
def concat(xs, dimension=1, *, vmem_budget_bytes=8 * 1024 * 1024):
    assert len(xs) >= 1
    ndim = xs[0].ndim
    d = dimension % ndim
    for x in xs[1:]:
        assert x.ndim == ndim
        assert x.shape[:d] == xs[0].shape[:d]
        assert x.shape[d + 1:] == xs[0].shape[d + 1:]

    out_dtype = jnp.result_type(*xs)
    outer = math.prod(xs[0].shape[:d]) if d > 0 else 1
    inner = math.prod(xs[0].shape[d + 1:]) if d + 1 < ndim else 1

    col_sizes = [x.shape[d] * inner for x in xs]
    col_offsets, off = [], 0
    for sz in col_sizes:
        col_offsets.append(off)
        off += sz
    total = off

    # Flatten to lane-dense 2D slabs: (outer, C_i * inner).
    xs2 = [x.astype(out_dtype).reshape(outer, sz)
           for x, sz in zip(xs, col_sizes)]

    # Row tile: largest multiple-of-8 row count that fits the VMEM budget
    # (inputs + output, double-buffered), or the full row count if small.
    itemsize = jnp.dtype(out_dtype).itemsize
    bytes_per_row = 2 * total * itemsize                 # inputs + output
    tm_cap = max(1, vmem_budget_bytes // (2 * bytes_per_row))  # x2 for dbl buf
    if outer <= tm_cap:
        tm = outer                                       # block == full dim
    else:
        tm = max(8, (tm_cap // 8) * 8)                   # multiple of 8
    grid = (pl.cdiv(outer, tm),)

    in_specs = [pl.BlockSpec((tm, sz), lambda i: (i, 0)) for sz in col_sizes]
    out_spec = pl.BlockSpec((tm, total), lambda i: (i, 0))

    out2 = pl.pallas_call(
        _make_concat_kernel(tuple(col_offsets), tuple(col_sizes)),
        out_shape=jax.ShapeDtypeStruct((outer, total), out_dtype),
        grid_spec=pltpu.PrefetchScalarGridSpec(
            num_scalar_prefetch=0,
            grid=grid,
            in_specs=in_specs,
            out_specs=out_spec,
        ),
        compiler_params=pltpu.CompilerParams(
            dimension_semantics=("parallel",)),
    )(*xs2)

    out_shape = (xs[0].shape[:d]
                 + (sum(x.shape[d] for x in xs),)
                 + xs[0].shape[d + 1:])
    return out2.reshape(out_shape)


# ---------------------------------------------------------------------------
# Demo / correctness check
# ---------------------------------------------------------------------------
if __name__ == "__main__":
    key = jax.random.PRNGKey(0)
    k1, k2, k3 = jax.random.split(key, 3)

    # NCHW activations, concatenated along the channel dim (dimension=1),
    # as the Concat module is used in YOLO-style nets.
    x1 = jax.random.normal(k1, (2, 4, 16, 16), jnp.float32)
    x2 = jax.random.normal(k2, (2, 4, 16, 16), jnp.float32)
    x3 = jax.random.normal(k3, (2, 8, 16, 16), jnp.float32)

    out = concat([x1, x2, x3], dimension=1)
    out = jax.block_until_ready(out)

    ref = jax.block_until_ready(jnp.concatenate([x1, x2, x3], axis=1))
    assert out.shape == (2, 16, 16, 16), out.shape
    assert out.dtype == ref.dtype
    assert jnp.array_equal(out, ref), float(jnp.max(jnp.abs(out - ref)))

    print("KERNEL_OK")
</pallas_src>

<mosaic_0001>
module attributes {stable_mosaic.version = 11 : i64} {
  func.func @kernel(%arg0: i32, %arg1: memref<2x1024xf32, #tpu.memory_space<vmem>>, %arg2: memref<2x1024xf32, #tpu.memory_space<vmem>>, %arg3: memref<2x2048xf32, #tpu.memory_space<vmem>>, %arg4: memref<2x4096xf32, #tpu.memory_space<vmem>>) attributes {dimension_semantics = [#tpu.dimension_semantics<parallel>], iteration_bounds = array<i64: 1>, scalar_prefetch = 0 : i64, scratch_operands = 0 : i64, tpu.core_type = #tpu.core_type<tc>, window_params = [{transform_indices = @transform_0, window_bounds = array<i64: 2, 1024>}, {transform_indices = @transform_1, window_bounds = array<i64: 2, 1024>}, {transform_indices = @transform_2, window_bounds = array<i64: 2, 2048>}, {transform_indices = @transform_3, window_bounds = array<i64: 2, 4096>}]} {
    %c0 = arith.constant 0 : index
    %c0_0 = arith.constant 0 : index
    %0 = vector.load %arg1[%c0, %c0_0] : memref<2x1024xf32, #tpu.memory_space<vmem>>, vector<2x1024xf32>
    %c0_1 = arith.constant 0 : index
    %c0_2 = arith.constant 0 : index
    %1 = vector.load %arg4[%c0_1, %c0_2] : memref<2x4096xf32, #tpu.memory_space<vmem>>, vector<2x1024xf32>
    tpu.vector_store %arg4[%c0_1, %c0_2], %0 {strides = array<i32>} : memref<2x4096xf32, #tpu.memory_space<vmem>>, vector<2x1024xf32>,
    %c0_3 = arith.constant 0 : index
    %c0_4 = arith.constant 0 : index
    %2 = vector.load %arg2[%c0_3, %c0_4] : memref<2x1024xf32, #tpu.memory_space<vmem>>, vector<2x1024xf32>
    %c0_5 = arith.constant 0 : index
    %c1024 = arith.constant 1024 : index
    %3 = vector.load %arg4[%c0_5, %c1024] : memref<2x4096xf32, #tpu.memory_space<vmem>>, vector<2x1024xf32>
    tpu.vector_store %arg4[%c0_5, %c1024], %2 {strides = array<i32>} : memref<2x4096xf32, #tpu.memory_space<vmem>>, vector<2x1024xf32>,
    %c0_6 = arith.constant 0 : index
    %c0_7 = arith.constant 0 : index
    %4 = vector.load %arg3[%c0_6, %c0_7] : memref<2x2048xf32, #tpu.memory_space<vmem>>, vector<2x2048xf32>
    %c0_8 = arith.constant 0 : index
    %c2048 = arith.constant 2048 : index
    %5 = vector.load %arg4[%c0_8, %c2048] : memref<2x4096xf32, #tpu.memory_space<vmem>>, vector<2x2048xf32>
    tpu.vector_store %arg4[%c0_8, %c2048], %4 {strides = array<i32>} : memref<2x4096xf32, #tpu.memory_space<vmem>>, vector<2x2048xf32>,
    return
  }
  func.func @transform_0(%arg0: i32) -> (i32, i32) {
    %c0_i32 = arith.constant 0 : i32
    %c0_i32_0 = arith.constant 0 : i32
    return %arg0, %c0_i32 : i32, i32
  }
  func.func @transform_1(%arg0: i32) -> (i32, i32) {
    %c0_i32 = arith.constant 0 : i32
    %c0_i32_0 = arith.constant 0 : i32
    return %arg0, %c0_i32 : i32, i32
  }
  func.func @transform_2(%arg0: i32) -> (i32, i32) {
    %c0_i32 = arith.constant 0 : i32
    %c0_i32_0 = arith.constant 0 : i32
    return %arg0, %c0_i32 : i32, i32
  }
  func.func @transform_3(%arg0: i32) -> (i32, i32) {
    %c0_i32 = arith.constant 0 : i32
    %c0_i32_0 = arith.constant 0 : i32
    return %arg0, %c0_i32 : i32, i32
  }
}

</mosaic_0001>

<bundles_post_ra>
// kernel: tpu_custom_call.1
= control target key start
LH: loop header
LB: loop body
LE: loop exit
PB: predicated region body
PF: predicated region fallthrough
CT: control target
= control target key end

     0   :  { %8 = vsyncpa [#allocation3], 0  ;;  %s232_s0 = inlined_call_operand.hbm [shape: f32[2,1024], index: 0, kind: input, shape index: {}]   ;;  %s233_s1 = inlined_call_operand.hbm [shape: f32[2,1024], index: 1, kind: input, shape index: {}]   ;;  %s234_s2 = inlined_call_operand.hbm [shape: f32[2,2048], index: 2, kind: input, shape index: {}]   ;;  %s235_s3 = inlined_call_operand.hbm [shape: f32[2,4096], index: 3, kind: output, shape index: {}]  }
   0x1   :  { %9 = vsyncpa [#allocation6], 0  ;;  %s27_s14 = sshll.u32 %s233_s1, 4  ;;  %s28_s14 = int_to_ptr.hbm [resolvable:$true] %s27_s14 }
   0x2   :  { %10 = vsyncpa [#allocation4], 0  ;;  %s196_s15 = smov [#allocation5]   ;;  %s16_s19 = sshll.u32 %s232_s0, 4  ;;  %s17_s19 = int_to_ptr.hbm [resolvable:$true] %s16_s19 }
   0x3   :  { %s29_s16 = sshll.u32 %s196_s15, 4  ;;  %s197_s20 = smov [#allocation2]   ;;  %s30_s16 = int_to_ptr.vmem [resolvable:$true] %s29_s16 }
   0x4   :  { %32 = dma.hbm_to_vmem [thread:$0]  %s28_s14, 256, %s30_s16, [#allocation6]  }
   0x5   :  { %s18_s21 = sshll.u32 %s197_s20, 4  ;;  %s38_s24 = sshll.u32 %s234_s2, 4  ;;  %s19_s21 = int_to_ptr.vmem [resolvable:$true] %s18_s21  ;;  %s39_s24 = int_to_ptr.hbm [resolvable:$true] %s38_s24 }
   0x6   :  { %21 = dma.hbm_to_vmem [thread:$0]  %s17_s19, 256, %s19_s21, [#allocation3]  }
   0x7   :  { %s198_s1 = smov [#allocation7]  }
   0x8   :  { %s40_s25 = sshll.u32 %s198_s1, 4  ;;  %s41_s25 = int_to_ptr.vmem [resolvable:$true] %s40_s25 }
   0x9   :  { %43 = dma.hbm_to_vmem [thread:$0]  %s39_s24, 512, %s41_s25, [#allocation6]  }
   0xa   :  { %190 = dma.done.wait [#allocation3], 256  }
   0xb   :  { %191 = vsyncadd [#allocation3], 4294967040 }
   0xc   :  { %192 = dma.done.wait [#allocation6], 768  }
   0xd   :  { %193 = vsyncadd [#allocation6], 4294966528  ;;  %v56_v0 = vld [vmem:[#allocation2] sm:$0xff]  ;;  %v57_v1 = vld [vmem:[#allocation2 + $0x8] sm:$0xff]  ;;  %s199_s0 = smov [#allocation8]   ;;  %s79_s28 = sshll.u32 %s235_s3, 4  ;;  %s80_s28 = int_to_ptr.hbm [resolvable:$true] %s79_s28 }
   0xe   :  { %v60_v2 = vld [vmem:[#allocation5] sm:$0xff]  ;;  %58 = vst [vmem:[#allocation8] sm:$0xff] %v56_v0  ;;  %v61_v3 = vld [vmem:[#allocation5 + $0x8] sm:$0xff]  ;;  %v64_v4 = vld [vmem:[#allocation7] sm:$0xff]  ;;  %s77_s2 = sshll.u32 %s199_s0, 4  ;;  %s78_s2 = int_to_ptr.vmem [resolvable:$true] %s77_s2 }
   0xf   :  { %59 = vst [vmem:[#allocation8 + $0x8] sm:$0xff] %v57_v1  ;;  %v65_v5 = vld [vmem:[#allocation7 + $0x8] sm:$0xff]  ;;  %v66_v6 = vld [vmem:[#allocation7 + $0x10] sm:$0xff]  ;;  %v67_v7 = vld [vmem:[#allocation7 + $0x18] sm:$0xff] }
  0x10   :  { %62 = vst [vmem:[#allocation8 + $0x10] sm:$0xff] %v60_v2 }
  0x11   :  { %63 = vst [vmem:[#allocation8 + $0x18] sm:$0xff] %v61_v3 }
  0x12   :  { %68 = vst [vmem:[#allocation8 + $0x20] sm:$0xff] %v64_v4 }
  0x13   :  { %69 = vst [vmem:[#allocation8 + $0x28] sm:$0xff] %v65_v5 }
  0x14   :  { %70 = vst [vmem:[#allocation8 + $0x30] sm:$0xff] %v66_v6 }
  0x15   :  { %71 = vst [vmem:[#allocation8 + $0x38] sm:$0xff] %v67_v7 }
  0x16   :  { %82 = dma.vmem_to_hbm [thread:$0]  %s78_s2, 1024, %s80_s28, [#allocation4]  }
  0x17   :  { %194 = dma.done.wait [#allocation4], 1024  }
  0x18   :  { %195 = vsyncadd [#allocation4], 4294966272 }
  0x19   :  { %87 = vsyncpa [#allocation3], 1 }
  0x1a   :  { %88 = vsyncpa [#allocation6], 1 }
  0x1b   :  { %89 = vsyncpa [#allocation4], 1 }

</bundles_post_ra>
